<compile_context>
chip_gen: v7x
topology: tpu7x:2x2x1
jax: 0.10.0
libtpu: 0.0.40
codegen_flags: <defaults>
</compile_context>

<pallas_src>
import functools

import jax
import jax.numpy as jnp
from jax.experimental import pallas as pl
from jax.experimental.pallas import tpu as pltpu

_SQRT3 = 3.0 ** 0.5


def _matern32_kernel(sig2_ref, c_ref,        # SMEM (L,): sigma^2, sqrt(3)/ls
                     x_ref, zt_ref,          # VMEM (TM, D) / (D, TN) tiles
                     out_ref,                # VMEM (1, TM, TN) output tile
                     r_sc):                  # VMEM (TM, TN) cached distances
    l = pl.program_id(2)

    @pl.when(l == 0)
    def _():
        # Pairwise Euclidean distance for this (i, j) tile, computed once and
        # reused across all L components.
        x = x_ref[...]                       # (TM, D)
        zt = zt_ref[...]                     # (D, TN) -- lane-dense coords
        d = x.shape[1]                       # static
        if d <= 8:
            # Pure VPU broadcast-diff: exact, no cancellation, no MXU waste.
            d2 = None
            for k in range(d):
                diff = x[:, k:k + 1] - zt[k:k + 1, :]        # (TM, TN)
                d2 = diff * diff if d2 is None else d2 + diff * diff
        else:
            # Large-D fallback: MXU inner product + norm correction.
            xx = jnp.sum(x * x, axis=1, keepdims=True)       # (TM, 1)
            zz = jnp.sum(zt * zt, axis=0, keepdims=True)     # (1, TN)
            xz = jnp.dot(x, zt, preferred_element_type=jnp.float32)
            d2 = jnp.maximum(xx + zz - 2.0 * xz, 0.0)
        r_sc[...] = jnp.sqrt(d2)

    # Scalar path: two SMEM reads; vector path: 1 EUP exp + 3 VPU ops/elem.
    val = c_ref[l] * r_sc[...]
    out_ref[0] = sig2_ref[l] * (1.0 + val) * jnp.exp(-val)


def _round_up(x, m):
    return (x + m - 1) // m * m


@functools.partial(jax.jit, static_argnames=("tm", "tn", "diag"))
def batched_matern32_forward(X, Z, sigma, lengthscale, *,
                             tm=512, tn=1024, diag=False):
    """Pallas implementation of batched_Matern32.forward(X, Z, diag)."""
    X = X.astype(jnp.float32)
    Z = Z.astype(jnp.float32)
    sigma = jnp.atleast_1d(sigma.astype(jnp.float32))
    lengthscale = jnp.atleast_1d(lengthscale.astype(jnp.float32))

    N, D = X.shape
    M, _ = Z.shape
    L = sigma.shape[0]

    if diag:
        # Trivial broadcast; matches the module's diag path (no kernel needed).
        return jnp.broadcast_to((sigma ** 2)[:, None], (L, N))

    # Lane-dense tiles: TM multiple of 8 (sublanes), TN multiple of 128 (lanes).
    tm = min(tm, _round_up(N, 8))
    tn = min(tn, _round_up(M, 128))
    Np = _round_up(N, tm)
    Mp = _round_up(M, tn)

    Xp = X if Np == N else jnp.pad(X, ((0, Np - N), (0, 0)))
    Zp = Z if Mp == M else jnp.pad(Z, ((0, Mp - M), (0, 0)))
    Zt = Zp.T                                # (D, Mp): Z coords lane-dense

    sig2 = sigma * sigma                     # (L,) scalar-prefetch operands
    c = _SQRT3 / lengthscale                 # (L,)

    grid = (Np // tm, Mp // tn, L)

    grid_spec = pltpu.PrefetchScalarGridSpec(
        num_scalar_prefetch=2,               # sig2, c -> SMEM
        grid=grid,
        in_specs=[
            pl.BlockSpec((tm, D), lambda i, j, l, s, c_: (i, 0)),   # X tile
            pl.BlockSpec((D, tn), lambda i, j, l, s, c_: (0, j)),   # Z^T tile
        ],
        out_specs=pl.BlockSpec((1, tm, tn), lambda i, j, l, s, c_: (l, i, j)),
        scratch_shapes=[pltpu.VMEM((tm, tn), jnp.float32)],
    )

    # VMEM budget: scratch tile + double-buffered output tile + tiny inputs.
    tile_bytes = tm * tn * 4
    vmem_need = 3 * tile_bytes + 4 * 4 * D * (tm + tn)
    vmem_limit = int(min(max(2 * vmem_need, 8 << 20), 32 << 20))

    out = pl.pallas_call(
        _matern32_kernel,
        out_shape=jax.ShapeDtypeStruct((L, Np, Mp), jnp.float32),
        grid_spec=grid_spec,
        compiler_params=pltpu.CompilerParams(
            dimension_semantics=("parallel", "parallel", "arbitrary"),
            vmem_limit_bytes=vmem_limit,
        ),
        # TODO(synk): if downstream tolerates bf16, cast the store + out_shape
        # to bfloat16 to halve HBM writeback (this kernel is writeback-bound);
        # kept f32 here to preserve the module's semantics.
    )(sig2, c, Xp, Zt)

    if Np != N or Mp != M:
        out = out[:, :N, :M]
    return out


# ----------------------------------------------------------------------------
# Pure-JAX reference (correctness check against the PyTorch semantics)
# ----------------------------------------------------------------------------
def _reference(X, Z, sigma, lengthscale):
    d2 = jnp.sum((X[:, None, :] - Z[None, :, :]) ** 2, axis=-1)   # (N, M)
    r = jnp.sqrt(d2)
    val = _SQRT3 * r[None, :, :] / lengthscale[:, None, None]
    return (sigma ** 2)[:, None, None] * (1.0 + val) * jnp.exp(-val)


if __name__ == "__main__":
    key = jax.random.PRNGKey(0)
    kx, kz, ks, kl = jax.random.split(key, 4)

    # Small shapes, deliberately not multiples of 8 / 128 to exercise padding.
    L, N, M, D = 4, 72, 150, 3

    X = jax.random.normal(kx, (N, D), dtype=jnp.float32)
    Z = jax.random.normal(kz, (M, D), dtype=jnp.float32)
    sigma = 0.5 + jax.random.uniform(ks, (L,), dtype=jnp.float32)
    lengthscale = 1.0 + jax.random.uniform(kl, (L,), dtype=jnp.float32)

    out = batched_matern32_forward(X, Z, sigma, lengthscale)
    out = jax.block_until_ready(out)

    ref = _reference(X, Z, sigma, lengthscale)
    assert out.shape == (L, N, M), out.shape
    max_err = float(jnp.max(jnp.abs(out - ref)))
    assert jnp.allclose(out, ref, atol=2e-5, rtol=2e-5), max_err

    # diag=True path (pure-JAX branch of the wrapper, matches the module).
    diag_out = batched_matern32_forward(X, Z, sigma, lengthscale, diag=True)
    diag_out = jax.block_until_ready(diag_out)
    assert diag_out.shape == (L, N)
    assert jnp.allclose(
        diag_out, jnp.broadcast_to((sigma ** 2)[:, None], (L, N)))

    print("KERNEL_OK")
</pallas_src>

<mosaic_0001>
module attributes {stable_mosaic.version = 11 : i64} {
  func.func @_matern32_kernel(%arg0: i32, %arg1: i32, %arg2: i32, %arg3: memref<4xf32, #tpu.memory_space<smem>>, %arg4: memref<4xf32, #tpu.memory_space<smem>>, %arg5: memref<72x3xf32, #tpu.memory_space<vmem>>, %arg6: memref<3x256xf32, #tpu.memory_space<vmem>>, %arg7: memref<1x72x256xf32, #tpu.memory_space<vmem>>, %arg8: memref<72x256xf32, #tpu.memory_space<vmem>>) attributes {dimension_semantics = [#tpu.dimension_semantics<parallel>, #tpu.dimension_semantics<parallel>, #tpu.dimension_semantics<arbitrary>], iteration_bounds = array<i64: 1, 1, 4>, scalar_prefetch = 2 : i64, scratch_operands = 1 : i64, tpu.core_type = #tpu.core_type<tc>, window_params = [{transform_indices = @transform_0, window_bounds = array<i64: 72, 3>}, {transform_indices = @transform_1, window_bounds = array<i64: 3, 256>}, {transform_indices = @transform_2, window_bounds = array<i64: 1, 72, 256>}]} {
    %c0_i32 = arith.constant 0 : i32
    %0 = arith.cmpi eq, %arg2, %c0_i32 : i32
    %1 = arith.extui %0 : i1 to i32
    %c0_i32_0 = arith.constant 0 : i32
    %2 = arith.cmpi ne, %1, %c0_i32_0 : i32
    scf.if %2 {
      %c0_6 = arith.constant 0 : index
      %c0_7 = arith.constant 0 : index
      %21 = vector.load %arg5[%c0_6, %c0_7] : memref<72x3xf32, #tpu.memory_space<vmem>>, vector<72x3xf32>
      %c0_8 = arith.constant 0 : index
      %c0_9 = arith.constant 0 : index
      %22 = vector.load %arg6[%c0_8, %c0_9] : memref<3x256xf32, #tpu.memory_space<vmem>>, vector<3x256xf32>
      %23 = vector.extract_strided_slice %21 {offsets = [0, 0], sizes = [72, 1], strides = [1, 1]} : vector<72x3xf32> to vector<72x1xf32>
      %24 = vector.extract_strided_slice %22 {offsets = [0, 0], sizes = [1, 256], strides = [1, 1]} : vector<3x256xf32> to vector<1x256xf32>
      %25 = vector.broadcast %23 : vector<72x1xf32> to vector<72x256xf32>
      %26 = vector.broadcast %24 : vector<1x256xf32> to vector<72x256xf32>
      %27 = arith.subf %25, %26 : vector<72x256xf32>
      %28 = arith.mulf %27, %27 : vector<72x256xf32>
      %29 = vector.extract_strided_slice %21 {offsets = [0, 1], sizes = [72, 1], strides = [1, 1]} : vector<72x3xf32> to vector<72x1xf32>
      %30 = vector.extract_strided_slice %22 {offsets = [1, 0], sizes = [1, 256], strides = [1, 1]} : vector<3x256xf32> to vector<1x256xf32>
      %31 = vector.broadcast %29 : vector<72x1xf32> to vector<72x256xf32>
      %32 = vector.broadcast %30 : vector<1x256xf32> to vector<72x256xf32>
      %33 = arith.subf %31, %32 : vector<72x256xf32>
      %34 = arith.mulf %33, %33 : vector<72x256xf32>
      %35 = arith.addf %28, %34 : vector<72x256xf32>
      %36 = vector.extract_strided_slice %21 {offsets = [0, 2], sizes = [72, 1], strides = [1, 1]} : vector<72x3xf32> to vector<72x1xf32>
      %37 = vector.extract_strided_slice %22 {offsets = [2, 0], sizes = [1, 256], strides = [1, 1]} : vector<3x256xf32> to vector<1x256xf32>
      %38 = vector.broadcast %36 : vector<72x1xf32> to vector<72x256xf32>
      %39 = vector.broadcast %37 : vector<1x256xf32> to vector<72x256xf32>
      %40 = arith.subf %38, %39 : vector<72x256xf32>
      %41 = arith.mulf %40, %40 : vector<72x256xf32>
      %42 = arith.addf %35, %41 : vector<72x256xf32>
      %43 = math.sqrt %42 : vector<72x256xf32>
      %c0_10 = arith.constant 0 : index
      %c0_11 = arith.constant 0 : index
      %44 = vector.load %arg8[%c0_10, %c0_11] : memref<72x256xf32, #tpu.memory_space<vmem>>, vector<72x256xf32>
      tpu.vector_store %arg8[%c0_10, %c0_11], %43 {strides = array<i32>} : memref<72x256xf32, #tpu.memory_space<vmem>>, vector<72x256xf32>,
    } else {
    }
    %3 = arith.index_cast %arg2 : i32 to index
    %4 = memref.load %arg4[%3] : memref<4xf32, #tpu.memory_space<smem>>
    %c0 = arith.constant 0 : index
    %c0_1 = arith.constant 0 : index
    %5 = vector.load %arg8[%c0, %c0_1] : memref<72x256xf32, #tpu.memory_space<vmem>>, vector<72x256xf32>
    %6 = vector.broadcast %4 : f32 to vector<72x256xf32>
    %7 = arith.mulf %6, %5 : vector<72x256xf32>
    %8 = arith.index_cast %arg2 : i32 to index
    %9 = memref.load %arg3[%8] : memref<4xf32, #tpu.memory_space<smem>>
    %cst = arith.constant 1.000000e+00 : f32
    %10 = vector.broadcast %cst : f32 to vector<72x256xf32>
    %11 = arith.addf %10, %7 : vector<72x256xf32>
    %12 = vector.broadcast %9 : f32 to vector<72x256xf32>
    %13 = arith.mulf %12, %11 : vector<72x256xf32>
    %cst_2 = arith.constant 0.000000e+00 : f32
    %14 = vector.broadcast %cst_2 : f32 to vector<72x256xf32>
    %15 = arith.subf %14, %7 : vector<72x256xf32>
    %16 = math.exp %15 : vector<72x256xf32>
    %17 = arith.mulf %13, %16 : vector<72x256xf32>
    %c0_3 = arith.constant 0 : index
    %c0_4 = arith.constant 0 : index
    %c0_5 = arith.constant 0 : index
    %18 = vector.load %arg7[%c0_3, %c0_4, %c0_5] : memref<1x72x256xf32, #tpu.memory_space<vmem>>, vector<1x72x256xf32>
    %19 = vector.shape_cast %18 : vector<1x72x256xf32> to vector<72x256xf32>
    %20 = vector.shape_cast %17 : vector<72x256xf32> to vector<1x72x256xf32>
    tpu.vector_store %arg7[%c0_3, %c0_4, %c0_5], %20 {strides = array<i32>} : memref<1x72x256xf32, #tpu.memory_space<vmem>>, vector<1x72x256xf32>,
    return
  }
  func.func @transform_0(%arg0: i32, %arg1: i32, %arg2: i32, %arg3: memref<4xf32, #tpu.memory_space<smem>>, %arg4: memref<4xf32, #tpu.memory_space<smem>>) -> (i32, i32) {
    %c0_i32 = arith.constant 0 : i32
    %c0_i32_0 = arith.constant 0 : i32
    return %arg0, %c0_i32 : i32, i32
  }
  func.func @transform_1(%arg0: i32, %arg1: i32, %arg2: i32, %arg3: memref<4xf32, #tpu.memory_space<smem>>, %arg4: memref<4xf32, #tpu.memory_space<smem>>) -> (i32, i32) {
    %c0_i32 = arith.constant 0 : i32
    %c0_i32_0 = arith.constant 0 : i32
    return %c0_i32, %arg1 : i32, i32
  }
  func.func @transform_2(%arg0: i32, %arg1: i32, %arg2: i32, %arg3: memref<4xf32, #tpu.memory_space<smem>>, %arg4: memref<4xf32, #tpu.memory_space<smem>>) -> (i32, i32, i32) {
    %c0_i32 = arith.constant 0 : i32
    return %arg2, %arg0, %arg1 : i32, i32, i32
  }
}

</mosaic_0001>

<bundles_post_ra>
// kernel: mul.1
= control target key start
LH: loop header
LB: loop body
LE: loop exit
PB: predicated region body
PF: predicated region fallthrough
CT: control target
= control target key end

     0   :  { %s34_s0 = inlined_call_operand.vmem [shape: f32[4], index: 0, kind: input, shape index: {}, may-alias: {0,1}]   ;;  %s35_s1 = inlined_call_operand.vmem [shape: f32[4], index: 1, kind: input, shape index: {}, may-alias: {0,1}]   ;;  %s36_s2 = inlined_call_operand.vmem [shape: f32[4], index: 2, kind: output, shape index: {}]  }
   0x1   :  { %v3_v0 = vld [vmem:[%s34_s0] sm:$0x1] }
   0x2   :  { %v4_v1 = vld [vmem:[%s35_s1] sm:$0x1] }
   0x3   :  { %v7_v2 = vmul.f32 %v4_v1, %v3_v0 }
   0x5   :  { %9 = vst [vmem:[%s36_s2] sm:$0x1] %v7_v2 }

// kernel: batched_matern32_forward.1
= control target key start
LH: loop header
LB: loop body
LE: loop exit
PB: predicated region body
PF: predicated region fallthrough
CT: control target
= control target key end

     0   :  { %s1717_s0 = inlined_call_operand.vmem [shape: f32[4], index: 0, kind: input, shape index: {}]   ;;  %s1718_s2 = inlined_call_operand.vmem [shape: f32[72,3], index: 2, kind: input, shape index: {}]   ;;  %s1719_s3 = inlined_call_operand.vmem [shape: f32[3,256], index: 3, kind: input, shape index: {}]   ;;  %s1720_s4 = inlined_call_operand.hbm [shape: f32[4,72,256], index: 4, kind: output, shape index: {}]   ;;  %s1721_s1 = inlined_call_operand.vmem [shape: f32[4], index: 1, kind: input, shape index: {}]  }
   0x1   :  { %s9_s17 = sshll.u32 %s1717_s0, 4  ;;  %s13_s20 = sshll.u32 %s1721_s1, 4  ;;  %s10_s17 = int_to_ptr.vmem [resolvable:$true] %s9_s17  ;;  %s14_s20 = int_to_ptr.vmem [resolvable:$true] %s13_s20 }
   0x2   :  { %s1110_s21 = scalar_lea.vmem %s10_s17, 16  ;;  %p1115_p1 = scmp.lt.s32.totalorder %s10_s17, %s10_s17 }
   0x3   :  { %p1111_p0 = scmp.ne.s32.totalorder %s10_s17, %s1110_s21  ;;  %p1116_p2 = scmp.lt.s32.totalorder %s1110_s21, %s1110_s21 }
   0x5   :  { %p1117_p3 = por %p1116_p2, %p1115_p1 }
   0x7   :  { %p1118_p4 = pnand %p1117_p3, %p1111_p0 }
   0x9   :  { %1121 = shalt.err (!%p1118_p4)  }
   0xa   :  { %s1216_s22 = smov [#allocation4]   ;;  %s1122_s23 = scalar_lea.vmem %s14_s20, 16 }
   0xb   :  { %12 = dma.vmem_to_smem %s10_s17, 16, %s1216_s22, [#allocation3] }
   0xc   :  { %p1123_p5 = scmp.ne.s32.totalorder %s14_s20, %s1122_s23  ;;  %p1127_p6 = scmp.lt.s32.totalorder %s14_s20, %s14_s20 }
   0xd   :  { %p1128_p7 = scmp.lt.s32.totalorder %s1122_s23, %s1122_s23 }
   0xf   :  { %p1129_p8 = por %p1128_p7, %p1127_p6 }
  0x11   :  { %p1130_p9 = pnand %p1129_p8, %p1123_p5 }
  0x13   :  { %1133 = shalt.err (!%p1130_p9)  }
  0x14   :  { %s1217_s0 = smov [#allocation5]  }
  0x15   :  { %16 = dma.vmem_to_smem %s14_s20, 16, %s1217_s0, [#allocation3] }
  0x16   :  { %1186 = dma.done.wait [#allocation3], 32 }
  0x17   :  { %1187 = vsyncadd [#allocation3], 4294967264 }
  0x18   :  { %18 = sfence }
  0x19   :  { %19 = vsyncpa [#allocation7], 0 }
  0x1a   :  { %21 = vsyncpa [#allocation7 + $0x1], 0  ;;  %s1255_s1 = smov 0   ;;  %s1257_s24 = smov 0  }
  0x1b   :  { %s1259_s25 = smov 0   ;;  %s1261_s26 = smov 0  }
  0x1c   :  { %s1263_s27 = smov 0   ;;  %s1265_s28 = smov 0  }
  0x1d LB: > { %s958_s29 = sadd.s32 4294967295, %s1214_s28   ;;  %s959_s30 = sadd.s32 4294967294, %s1214_s28   ;;  %s1214_s28 = sphi %s1265_s28, %s27_s28   ;;  %s1210_s27 = sphi %s1263_s27, %s1728_s27   ;;  %s1206_s26 = sphi %s1261_s26, %s1727_s26   ;;  %s1202_s25 = sphi %s1259_s25, %s1726_s25   ;;  %s1198_s24 = sphi %s1257_s24, %s1725_s24   ;;  %s1194_s1 = sphi %s1255_s1, %s1724_s1  }
  0x1e   : > { %s39_s5 = sadd.s32 1, %s1210_s27  ;;  %s109_s6 = sadd.s32 1, %s1202_s25 }
  0x1f   : > { %p40_p10 = scmp.ge.s32.totalorder %s39_s5, 4  ;;  %p119_p11 = scmp.ne.s32.totalorder %s1202_s25, %s1198_s24 }
  0x20   : > { %p120_p12 = scmp.eq.s32.totalorder %s958_s29, 3  ;;  %p125_p13 = scmp.ne.s32.totalorder %s1198_s24, %s1194_s1 }
  0x21   : > { %s1730_s5 = smov (%p40_p10, %s39_s5), 0  ;;  %p126_p1 = scmp.eq.s32.totalorder %s959_s30, 3 }
  0x22   : > { %p1295_p0 = por %p120_p12, %p119_p11  ;;  %s102_s8 = ssub.s32 %s1210_s27, %s1730_s5 }
  0x23   : > { %p963_p2 = scmp.ge.s32.totalorder %s1214_s28, 1  ;;  %p107_p3 = scmp.eq.s32.totalorder %s102_s8, 0 }
  0x24   : > { %p1302_p4 = por %p126_p1, %p125_p13  ;;  %p162_p5 = scmp.lt.s32.totalorder %s1214_s28, 5 }
  0x25   : > { %s1308_s10 = scalar_select %p107_p3, %s1202_s25, %s109_s6  }
  0x26   : > { %p163_p6 = pnand %p963_p2, %p162_p5 }
  0x27   : > { %s186_s11 = sand.u32 (!%p163_p6), 1, %s1198_s24   ;;  %p964_p7 = scmp.ne.s32.totalorder (!%p163_p6), %s1206_s26, 0 }
  0x28   : > { %166 = sbr.rel (%p163_p6) target bundleno = 337 (0x151), region = 28 }
  0x29   : > { %s968_s12 = smul.u32 (!%p163_p6), 144, %s186_s11 }
  0x2b   : > { %s1313_s13 = scalar_lea.vmem (!%p163_p6), [#allocation6], %s968_s12 }
  0x2f   : > { %206 = sbr.rel (%p964_p7) target bundleno = 273 (0x111), region = 32  ;;  %v209_v0 = vld [vmem:[%s1718_s2 + $0x10] sm:$0xff] (!%p964_p7)  ;;  %v207_v1 = vld [vmem:[%s1718_s2] sm:$0xff] (!%p964_p7)  ;;  %v1218_v2 = vmov (!%p964_p7), 0   ;;  %v210_v3 = vld [vmem:[%s1718_s2 + $0x18] sm:$0xff] (!%p964_p7)  ;;  %v1219_v10 = vmov (!%p964_p7), 1   ;;  %v263_v14 = vlaneseq (!%p964_p7) }
  0x30   : > { %1033 = vset.pattern.permute.xlu1 (!%p964_p7), %v1218_v2  ;;  %1032 = vset.pattern.permute.xlu0 (!%p964_p7), %v1218_v2  ;;  %v208_v4 = vld [vmem:[%s1718_s2 + $0x8] sm:$0xff] (!%p964_p7)  ;;  %v211_v6 = vld [vmem:[%s1718_s2 + $0x20] sm:$0xff] (!%p964_p7)  ;;  %v214_v7 = vld [vmem:[%s1718_s2 + $0x38] sm:$0xff] (!%p964_p7)  ;;  %v1220_v11 = vmov (!%p964_p7), 2  }
  0x31   : > { %229 = vperm.xlu1 (!%p964_p7), %1033, %v209_v0   ;;  %219 = vperm.xlu0 (!%p964_p7), %1032, %v207_v1   ;;  %v212_v5 = vld [vmem:[%s1718_s2 + $0x28] sm:$0xff] (!%p964_p7)  ;;  %v213_v8 = vld [vmem:[%s1718_s2 + $0x30] sm:$0xff] (!%p964_p7)  ;;  %v215_v9 = vld [vmem:[%s1718_s2 + $0x40] sm:$0xff] (!%p964_p7)  ;;  %v264_v17 = vshrl.u32 (!%p964_p7), %v263_v14, 7 }
  0x32   : > { %v216_v22 = vld [vmem:[%s1719_s3] sm:$0x77] (!%p964_p7) }
  0x33   : > { %v265_v20 = vsub.s32 (!%p964_p7), 0, %v264_v17  ;;  %v269_v21 = vsub.s32 (!%p964_p7), 4, %v264_v17  ;;  %v355_v27 = vsub.s32 (!%p964_p7), 1, %v264_v17  ;;  %v359_v29 = vsub.s32 (!%p964_p7), 5, %v264_v17 }
  0x34   : > { %v463_v30 = vsub.s32 (!%p964_p7), 2, %v264_v17  ;;  %v467_v31 = vsub.s32 (!%p964_p7), 6, %v264_v17 }
  0x35   : > { %234 = vperm.xlu1 (!%p964_p7), %1033, %v210_v3   ;;  %224 = vperm.xlu0 (!%p964_p7), %1032, %v208_v4   ;;  %v266_v25 = vrot.slane (!%p964_p7), %v216_v22, %v265_v20  ;;  %v270_v26 = vrot.slane (!%p964_p7), %v216_v22, %v269_v21  ;;  %v356_v35 = vrot.slane (!%p964_p7), %v216_v22, %v355_v27 }
  0x36   : > { %v360_v36 = vrot.slane %v216_v22, %v359_v29  ;;  %v464_v37 = vrot.slane %v216_v22, %v463_v30  ;;  %v468_v38 = vrot.slane %v216_v22, %v467_v31 }
  0x37   : > { %v276_v32 = vrot.slane %v266_v25, %v265_v20  ;;  %v280_v33 = vrot.slane %v270_v26, %v265_v20  ;;  %v1348_v51 = vrot.slane %v356_v35, %v355_v27 }
  0x38   : > { %v1350_v53 = vrot.slane %v360_v36, %v355_v27  ;;  %v1352_v54 = vrot.slane %v464_v37, %v463_v30  ;;  %v1354_v55 = vrot.slane %v468_v38, %v463_v30 }
  0x39   : > { %244 = vperm.xlu1 %1033, %v212_v5   ;;  %239 = vperm.xlu0 %1032, %v211_v6  }
  0x3d   : > { %254 = vperm.xlu1 %1033, %v214_v7   ;;  %249 = vperm.xlu0 %1032, %v213_v8  }
  0x41   : > { %1034 = vset.pattern.permute.xlu1 %v1219_v10  ;;  %259 = vperm.xlu0 %1032, %v215_v9  }
  0x42   : > { %318 = vperm.xlu1 %1034, %v207_v1  }
  0x45   : > { %1035 = vset.pattern.permute.xlu0 %v1219_v10 }
  0x46   : > { %326 = vperm.xlu1 %1034, %v209_v0   ;;  %322 = vperm.xlu0 %1035, %v208_v4  }
  0x4a   : > { %330 = vperm.xlu1 %1034, %v210_v3   ;;  %334 = vperm.xlu0 %1035, %v211_v6  }
  0x4e   : > { %338 = vperm.xlu1 %1034, %v212_v5   ;;  %342 = vperm.xlu0 %1035, %v213_v8  }
  0x52   : > { %346 = vperm.xlu1 %1034, %v214_v7   ;;  %350 = vperm.xlu0 %1035, %v215_v9  }
  0x56   : > { %1036 = vset.pattern.permute.xlu1 %v1220_v11  ;;  %1037 = vset.pattern.permute.xlu0 %v1220_v11 }
  0x57   : > { %426 = vperm.xlu1 %1036, %v207_v1   ;;  %430 = vperm.xlu0 %1037, %v208_v4  }
  0x5b   : > { %434 = vperm.xlu1 %1036, %v209_v0   ;;  %442 = vperm.xlu0 %1037, %v211_v6  }
  0x5f   : > { %438 = vperm.xlu1 %1036, %v210_v3   ;;  %450 = vperm.xlu0 %1037, %v213_v8  }
  0x63   : > { %446 = vperm.xlu1 %1036, %v212_v5   ;;  %458 = vperm.xlu0 %1037, %v215_v9  }
  0x67   : > { %454 = vperm.xlu1 %1036, %v214_v7  }
  0xb0   : > { %v230_v12 = vpop.permute.xlu1 %229  ;;  %v220_v13 = vpop.permute.xlu0 %219 }
  0xb1   : > { %v285_v39 = vsub.f32 %v230_v12, %v276_v32  ;;  %v286_v40 = vsub.f32 %v230_v12, %v280_v33  ;;  %v281_v41 = vsub.f32 %v220_v13, %v276_v32  ;;  %v282_v42 = vsub.f32 %v220_v13, %v280_v33 }
  0xb3   : > { %v303_v56 = vmul.f32 %v285_v39, %v285_v39  ;;  %v304_v57 = vmul.f32 %v286_v40, %v286_v40  ;;  %v299_v58 = vmul.f32 %v281_v41, %v281_v41  ;;  %v300_v59 = vmul.f32 %v282_v42, %v282_v42 }
  0xb4   : > { %v235_v15 = vpop.permute.xlu1 %234  ;;  %v225_v16 = vpop.permute.xlu0 %224 }
  0xb5   : > { %v287_v45 = vsub.f32 %v235_v15, %v276_v32  ;;  %v288_v46 = vsub.f32 %v235_v15, %v280_v33  ;;  %v283_v47 = vsub.f32 %v225_v16, %v276_v32  ;;  %v284_v48 = vsub.f32 %v225_v16, %v280_v33 }
  0xb7   : > { %v305_v62 = vmul.f32 %v287_v45, %v287_v45  ;;  %v306_v63 = vmul.f32 %v288_v46, %v288_v46  ;;  %v301_v0 = vmul.f32 %v283_v47, %v283_v47  ;;  %v302_v2 = vmul.f32 %v284_v48, %v284_v48 }
  0xb8   : > { %v245_v18 = vpop.permute.xlu1 %244  ;;  %v240_v19 = vpop.permute.xlu0 %239 }
  0xb9   : > { %v291_v49 = vsub.f32 %v245_v18, %v276_v32  ;;  %v292_v50 = vsub.f32 %v245_v18, %v280_v33  ;;  %v289_v52 = vsub.f32 %v240_v19, %v276_v32  ;;  %v290_v1 = vsub.f32 %v240_v19, %v280_v33 }
  0xbb   : > { %v1356_v3 = vmul.f32 %v291_v49, %v291_v49  ;;  %v1358_v4 = vmul.f32 %v292_v50, %v292_v50  ;;  %v307_v6 = vmul.f32 %v289_v52, %v289_v52  ;;  %v1367_v16 = vmul.f32 %v290_v1, %v290_v1 }
  0xbc   : > { %v1346_v23 = vpop.permute.xlu1 %254  ;;  %v250_v24 = vpop.permute.xlu0 %249 }
  0xbd   : > { %v295_v10 = vsub.f32 %v1346_v23, %v276_v32  ;;  %v293_v11 = vsub.f32 %v250_v24, %v276_v32  ;;  %v294_v17 = vsub.f32 %v250_v24, %v280_v33  ;;  %v1373_v26 = vsub.f32 %v1346_v23, %v280_v33 }
  0xbf   : > { %v1375_v31 = vmul.f32 %v295_v10, %v295_v10  ;;  %v312_v38 = vmul.f32 %v294_v17, %v294_v17 }
  0xc0   : > { %v260_v28 = vpop.permute.xlu0 %259 }
  0xc1   : > { %v319_v34 = vpop.permute.xlu1 %318  ;;  %v297_v20 = vsub.f32 %v260_v28, %v276_v32  ;;  %v298_v21 = vsub.f32 %v260_v28, %v280_v33 }
  0xc2   : > { %v371_v5 = vsub.f32 %v319_v34, %v1348_v51  ;;  %v372_v7 = vsub.f32 %v319_v34, %v1350_v53  ;;  %v311_v34 = vmul.f32 %v293_v11, %v293_v11 }
  0xc3   : > { %v315_v40 = vmul.f32 %v297_v20, %v297_v20  ;;  %v316_v41 = vmul.f32 %v298_v21, %v298_v21 }
  0xc4   : > { %v389_v22 = vmul.f32 %v371_v5, %v371_v5  ;;  %v390_v27 = vmul.f32 %v372_v7, %v372_v7 }
  0xc5   : > { %v327_v43 = vpop.permute.xlu1 %326  ;;  %v323_v44 = vpop.permute.xlu0 %322 }
  0xc6   : > { %v375_v8 = vsub.f32 %v327_v43, %v1348_v51  ;;  %v376_v9 = vsub.f32 %v327_v43, %v1350_v53  ;;  %v373_v12 = vsub.f32 %v323_v44, %v1348_v51  ;;  %v374_v13 = vsub.f32 %v323_v44, %v1350_v53 }
  0xc7   : > { %v407_v42 = vadd.f32 %v389_v22, %v299_v58  ;;  %v408_v33 = vadd.f32 %v390_v27, %v300_v59 }
  0xc8   : > { %v393_v29 = vmul.f32 %v375_v8, %v375_v8  ;;  %v394_v30 = vmul.f32 %v376_v9, %v376_v9  ;;  %v391_v35 = vmul.f32 %v373_v12, %v373_v12  ;;  %v392_v24 = vmul.f32 %v374_v13, %v374_v13 }
  0xc9   : > { %v331_v60 = vpop.permute.xlu1 %330  ;;  %v335_v61 = vpop.permute.xlu0 %334 }
  0xca   : > { %v377_v18 = vsub.f32 %v331_v60, %v1348_v51  ;;  %v378_v19 = vsub.f32 %v331_v60, %v1350_v53  ;;  %v379_v25 = vsub.f32 %v335_v61, %v1348_v51  ;;  %v380_v28 = vsub.f32 %v335_v61, %v1350_v53 }
  0xcb   : > { %v1378_v43 = vadd.f32 %v393_v29, %v303_v56  ;;  %v1380_v44 = vadd.f32 %v394_v30, %v304_v57  ;;  %v409_v46 = vadd.f32 %v391_v35, %v301_v0  ;;  %v410_v47 = vadd.f32 %v392_v24, %v302_v2 }
  0xcc   : > { %v395_v39 = vmul.f32 %v377_v18, %v377_v18  ;;  %v396_v32 = vmul.f32 %v378_v19, %v378_v19  ;;  %v397_v23 = vmul.f32 %v379_v25, %v379_v25  ;;  %v398_v60 = vmul.f32 %v380_v28, %v380_v28 }
  0xcd   : > { %v339_v14 = vpop.permute.xlu1 %338  ;;  %v343_v15 = vpop.permute.xlu0 %342 }
  0xce   : > { %v381_v45 = vsub.f32 %v339_v14, %v1348_v51  ;;  %v382_v48 = vsub.f32 %v339_v14, %v1350_v53  ;;  %v383_v49 = vsub.f32 %v343_v15, %v1348_v51  ;;  %v1385_v50 = vadd.f32 %v395_v39, %v305_v62 }
  0xcf   : > { %v1387_v52 = vadd.f32 %v396_v32, %v306_v63  ;;  %v384_v58 = vsub.f32 %v343_v15, %v1350_v53  ;;  %v415_v61 = vadd.f32 %v397_v23, %v307_v6  ;;  %v416_v30 = vadd.f32 %v398_v60, %v1367_v16 }
  0xd0   : > { %v399_v2 = vmul.f32 %v381_v45, %v381_v45  ;;  %v400_v7 = vmul.f32 %v382_v48, %v382_v48  ;;  %v401_v8 = vmul.f32 %v383_v49, %v383_v49 }
  0xd1   : > { %v347_v36 = vpop.permute.xlu1 %346  ;;  %v351_v37 = vpop.permute.xlu0 %350  ;;  %v402_v11 = vmul.f32 %v384_v58, %v384_v58 }
  0xd2   : > { %v387_v57 = vsub.f32 %v351_v37, %v1348_v51  ;;  %v388_v5 = vsub.f32 %v351_v37, %v1350_v53  ;;  %v385_v6 = vsub.f32 %v347_v36, %v1348_v51  ;;  %v386_v17 = vsub.f32 %v347_v36, %v1350_v53 }
  0xd3   : > { %v1413_v35 = vadd.f32 %v399_v2, %v1356_v3  ;;  %v1416_v24 = vadd.f32 %v400_v7, %v1358_v4  ;;  %v419_v36 = vadd.f32 %v401_v8, %v311_v34  ;;  %v420_v37 = vadd.f32 %v402_v11, %v312_v38 }
  0xd4   : > { %v405_v18 = vmul.f32 %v387_v57, %v387_v57  ;;  %v406_v21 = vmul.f32 %v388_v5, %v388_v5  ;;  %v1419_v39 = vmul.f32 %v385_v6, %v385_v6 }
  0xd6   : > { %v427_v59 = vpop.permute.xlu1 %426  ;;  %v431_v56 = vpop.permute.xlu0 %430  ;;  %v1424_v23 = vadd.f32 %v405_v18, %v315_v40  ;;  %v1426_v16 = vadd.f32 %v406_v21, %v316_v41 }
  0xd7   : > { %v479_v1 = vsub.f32 %v427_v59, %v1352_v54  ;;  %v480_v0 = vsub.f32 %v427_v59, %v1354_v55  ;;  %v481_v62 = vsub.f32 %v431_v56, %v1352_v54  ;;  %v482_v63 = vsub.f32 %v431_v56, %v1354_v55 }
  0xd9   : > { %v497_v9 = vmul.f32 %v479_v1, %v479_v1  ;;  %v498_v10 = vmul.f32 %v480_v0, %v480_v0  ;;  %v499_v12 = vmul.f32 %v481_v62, %v481_v62  ;;  %v500_v13 = vmul.f32 %v482_v63, %v482_v63 }
  0xda   : > { %v435_v14 = vpop.permute.xlu1 %434  ;;  %v443_v15 = vpop.permute.xlu0 %442 }
  0xdb   : > { %v1398_v19 = vadd.f32 %v497_v9, %v407_v42  ;;  %v1400_v20 = vadd.f32 %v498_v10, %v408_v33  ;;  %v1402_v22 = vadd.f32 %v499_v12, %v409_v46  ;;  %v1404_v25 = vadd.f32 %v500_v13, %v410_v47 }
  0xdc   : > { %v483_v27 = vsub.f32 %v435_v14, %v1352_v54  ;;  %v484_v51 = vsub.f32 %v435_v14, %v1354_v55  ;;  %v487_v29 = vsub.f32 %v443_v15, %v1352_v54  ;;  %v488_v53 = vsub.f32 %v443_v15, %v1354_v55 }
  0xdd   : > { %1038 = vrsqrt.f32 %v1398_v19  ;;  %v1422_v42 = vmul.f32 %v386_v17, %v386_v17  ;;  %vm535_vm0 = vcmp.eq.f32.partialorder %v1398_v19, inf  ;;  %vm537_vm1 = vcmp.eq.f32.partialorder %v1398_v19, 0.0 }
  0xde   : > { %1040 = vrsqrt.f32 %v1400_v20  ;;  %v439_v32 = vpop.permute.xlu1 %438  ;;  %v451_v28 = vpop.permute.xlu0 %450  ;;  %v501_v3 = vmul.f32 %v483_v27, %v483_v27  ;;  %v502_v4 = vmul.f32 %v484_v51, %v484_v51  ;;  %v505_v33 = vmul.f32 %v487_v29, %v487_v29 }
  0xdf   : > { %1042 = vrsqrt.f32 %v1402_v22  ;;  %v506_v45 = vmul.f32 %v488_v53, %v488_v53  ;;  %v485_v34 = vsub.f32 %v439_v32, %v1352_v54  ;;  %v486_v38 = vsub.f32 %v439_v32, %v1354_v55 }
  0xe0   : > { %1044 = vrsqrt.f32 %v1404_v25  ;;  %v491_v46 = vsub.f32 %v451_v28, %v1352_v54  ;;  %v1435_v40 = vadd.f32 %v501_v3, %v1378_v43  ;;  %v1438_v41 = vadd.f32 %v502_v4, %v1380_v44 }
  0xe1   : > { %v1440_v47 = vadd.f32 %v505_v33, %v415_v61  ;;  %v538_v48 = vand.u32 2147483648, %v1398_v19  ;;  %vm542_vm2 = vcmp.eq.f32.partialorder %v1400_v20, inf  ;;  %v1444_v49 = vadd.f32 %v506_v45, %v416_v30 }
  0xe2   : > { %v492_v60 = vsub.f32 %v451_v28, %v1354_v55  ;;  %vm544_vm3 = vcmp.eq.f32.partialorder %v1400_v20, 0.0  ;;  %1046 = vrsqrt.f32 %v1435_v40  ;;  %v503_v58 = vmul.f32 %v485_v34, %v485_v34  ;;  %v447_v21 = vpop.permute.xlu1 %446 }
  0xe3   : > { %v504_v43 = vmul.f32 %v486_v38, %v486_v38  ;;  %v545_v59 = vand.u32 2147483648, %v1400_v20  ;;  %vm549_vm4 = vcmp.eq.f32.partialorder %v1402_v22, inf  ;;  %1048 = vrsqrt.f32 %v1438_v41 }
  0xe4   : > { %v509_v44 = vmul.f32 %v491_v46, %v491_v46  ;;  %vm551_vm5 = vcmp.eq.f32.partialorder %v1402_v22, 0.0  ;;  %v552_v61 = vand.u32 2147483648, %v1402_v22  ;;  %vm556_vm6 = vcmp.eq.f32.partialorder %v1404_v25, inf }
  0xe5   : > { %1050 = vrsqrt.f32 %v1440_v47  ;;  %vm558_vm7 = vcmp.eq.f32.partialorder %v1404_v25, 0.0  ;;  %v510_v0 = vmul.f32 %v492_v60, %v492_v60  ;;  %v559_v62 = vand.u32 2147483648, %v1404_v25 }
  0xe6   : > { %1052 = vrsqrt.f32 %v1444_v49  ;;  %v1462_v63 = vadd.f32 %v503_v58, %v1385_v50  ;;  %v1465_v7 = vadd.f32 %v504_v43, %v1387_v52  ;;  %vm563_vm8 = vcmp.eq.f32.partialorder %v1435_v40, inf }
  0xe7   : > { %v1039_v56 = vpop.eup %1038  ;;  %v1472_v11 = vadd.f32 %v509_v44, %v419_v36  ;;  %vm565_vm9 = vcmp.eq.f32.partialorder %v1435_v40, 0.0  ;;  %v1487_v14 = vadd.f32 %v510_v0, %v420_v37  ;;  %v566_v18 = vand.u32 2147483648, %v1435_v40 }
  0xe8   : > { %v1041_v57 = vpop.eup %1040  ;;  %v534_v1 = vmul.f32 %v1039_v56, %v1398_v19  ;;  %1054 = vrsqrt.f32 %v1462_v63  ;;  %vm570_vm10 = vcmp.eq.f32.partialorder %v1438_v41, inf  ;;  %vm572_vm11 = vcmp.eq.f32.partialorder %v1438_v41, 0.0 }
  0xe9   : > { %v1043_v2 = vpop.eup %1042  ;;  %v541_v5 = vmul.f32 %v1041_v57, %v1400_v20  ;;  %1056 = vrsqrt.f32 %v1465_v7  ;;  %vm591_vm12 = vcmp.eq.f32.partialorder %v1440_v47, inf  ;;  %vm593_vm13 = vcmp.eq.f32.partialorder %v1440_v47, 0.0 }
  0xea   : > { %v1045_v8 = vpop.eup %1044  ;;  %v536_v9 = vsel %vm535_vm0, %v1398_v19, %v534_v1  ;;  %v548_v10 = vmul.f32 %v1043_v2, %v1402_v22  ;;  %v594_v27 = vand.u32 2147483648, %v1440_v47  ;;  %1058 = vrsqrt.f32 %v1472_v11 }
  0xeb   : > { %v539_v6 = vsel %vm537_vm1, %v538_v48, %v536_v9  ;;  %v543_v50 = vsel %vm542_vm2, %v1400_v20, %v541_v5  ;;  %v555_v52 = vmul.f32 %v1045_v8, %v1404_v25  ;;  %v573_v20 = vand.u32 2147483648, %v1438_v41 }
  0xec   : > { %v546_v12 = vsel %vm544_vm3, %v545_v59, %v543_v50  ;;  %659 = vst [vmem:[#allocation2] sm:$0xff] %v539_v6  ;;  %v550_v13 = vsel %vm549_vm4, %v1402_v22, %v548_v10  ;;  %v1047_v22 = vpop.eup %1046  ;;  %vm598_vm14 = vcmp.eq.f32.partialorder %v1444_v49, inf  ;;  %vm600_vm15 = vcmp.eq.f32.partialorder %v1444_v49, 0.0  ;;  %v455_v6 = vpop.permute.xlu1 %454 }
  0xed   : > { %660 = vst [vmem:[#allocation2 + $0x8] sm:$0xff] %v546_v12  ;;  %v553_v15 = vsel %vm551_vm5, %v552_v61, %v550_v13  ;;  %v557_v17 = vsel %vm556_vm6, %v1404_v25, %v555_v52  ;;  %v459_v25 = vpop.permute.xlu0 %458  ;;  %v1049_v51 = vpop.eup %1048  ;;  %v562_v29 = vmul.f32 %v1047_v22, %v1435_v40  ;;  %1060 = vrsqrt.f32 %v1487_v14 }
  0xee   : > { %v560_v19 = vsel %vm558_vm7, %v559_v62, %v557_v17  ;;  %661 = vst [vmem:[#allocation2 + $0x10] sm:$0xff] %v553_v15  ;;  %v569_v30 = vmul.f32 %v1049_v51, %v1438_v41  ;;  %v601_v36 = vand.u32 2147483648, %v1444_v49  ;;  %v489_v37 = vsub.f32 %v447_v21, %v1352_v54 }
  0xef   : > { %662 = vst [vmem:[#allocation2 + $0x18] sm:$0xff] %v560_v19  ;;  %v1051_v53 = vpop.eup %1050  ;;  %v490_v32 = vsub.f32 %v447_v21, %v1354_v55  ;;  %v564_v3 = vsel %vm563_vm8, %v1435_v40, %v562_v29  ;;  %v495_v33 = vsub.f32 %v459_v25, %v1352_v54  ;;  %v496_v45 = vsub.f32 %v459_v25, %v1354_v55 }
  0xf0   : > { %v1053_v28 = vpop.eup %1052  ;;  %v590_v4 = vmul.f32 %v1051_v53, %v1440_v47  ;;  %v567_v34 = vsel %vm565_vm9, %v566_v18, %v564_v3  ;;  %v571_v38 = vsel %vm570_vm10, %v1438_v41, %v569_v30  ;;  %v507_v48 = vmul.f32 %v489_v37, %v489_v37 }
  0xf1   : > { %v597_v46 = vmul.f32 %v1053_v28, %v1444_v49  ;;  %v574_v60 = vsel %vm572_vm11, %v573_v20, %v571_v38  ;;  %663 = vst [vmem:[#allocation2 + $0x20] sm:$0xff] %v567_v34  ;;  %v508_v43 = vmul.f32 %v490_v32, %v490_v32  ;;  %v513_v59 = vmul.f32 %v495_v33, %v495_v33 }
  0xf2   : > { %v592_v58 = vsel %vm591_vm12, %v1440_v47, %v590_v4  ;;  %v1055_v44 = vpop.eup %1054  ;;  %664 = vst [vmem:[#allocation2 + $0x28] sm:$0xff] %v574_v60  ;;  %v1536_v61 = vadd.f32 %v507_v48, %v1413_v35  ;;  %v514_v41 = vmul.f32 %v496_v45, %v496_v45  ;;  %vm577_vm0 = vcmp.eq.f32.partialorder %v1462_v63, inf }
  0xf3   : > { %v595_v40 = vsel %vm593_vm13, %v594_v27, %v592_v58  ;;  %v599_v56 = vsel %vm598_vm14, %v1444_v49, %v597_v46  ;;  %v576_v1 = vmul.f32 %v1055_v44, %v1462_v63  ;;  %v1542_v0 = vadd.f32 %v508_v43, %v1416_v24  ;;  %v1057_v2 = vpop.eup %1056 }
  0xf4   : > { %v602_v57 = vsel %vm600_vm15, %v601_v36, %v599_v56  ;;  %667 = vst [vmem:[#allocation2 + $0x40] sm:$0xff] %v595_v40  ;;  %v1545_v47 = vadd.f32 %v513_v59, %v1424_v23  ;;  %vm579_vm1 = vcmp.eq.f32.partialorder %v1462_v63, 0.0  ;;  %v580_v35 = vand.u32 2147483648, %v1462_v63  ;;  %v1059_v24 = vpop.eup %1058 }
  0xf5   : > { %668 = vst [vmem:[#allocation2 + $0x48] sm:$0xff] %v602_v57  ;;  %1062 = vrsqrt.f32 %v1536_v61  ;;  %v578_v49 = vsel %vm577_vm0, %v1462_v63, %v576_v1  ;;  %v583_v5 = vmul.f32 %v1057_v2, %v1465_v7  ;;  %vm584_vm2 = vcmp.eq.f32.partialorder %v1465_v7, inf }
  0xf6   : > { %1064 = vrsqrt.f32 %v1542_v0  ;;  %v581_v23 = vsel %vm579_vm1, %v580_v35, %v578_v49  ;;  %vm586_vm3 = vcmp.eq.f32.partialorder %v1465_v7, 0.0  ;;  %v587_v62 = vand.u32 2147483648, %v1465_v7 }
  0xf7   : > { %v1558_v8 = vadd.f32 %v514_v41, %v1426_v16  ;;  %v1061_v9 = vpop.eup %1060  ;;  %v585_v10 = vsel %vm584_vm2, %v1465_v7, %v583_v5  ;;  %665 = vst [vmem:[#allocation2 + $0x30] sm:$0xff] %v581_v23  ;;  %v618_v63 = vmul.f32 %v1059_v24, %v1472_v11  ;;  %vm619_vm4 = vcmp.eq.f32.partialorder %v1472_v11, inf }
  0xf8   : > { %1066 = vrsqrt.f32 %v1545_v47  ;;  %v588_v50 = vsel %vm586_vm3, %v587_v62, %v585_v10  ;;  %vm621_vm5 = vcmp.eq.f32.partialorder %v1472_v11, 0.0  ;;  %v622_v52 = vand.u32 2147483648, %v1472_v11 }
  0xf9   : > { %v625_v12 = vmul.f32 %v1061_v9, %v1487_v14  ;;  %666 = vst [vmem:[#allocation2 + $0x38] sm:$0xff] %v588_v50  ;;  %v620_v16 = vsel %vm619_vm4, %v1472_v11, %v618_v63  ;;  %vm626_vm6 = vcmp.eq.f32.partialorder %v1487_v14, inf  ;;  %v629_v7 = vand.u32 2147483648, %v1487_v14 }
  0xfa   : > { %1068 = vrsqrt.f32 %v1558_v8  ;;  %v623_v13 = vsel %vm621_vm5, %v622_v52, %v620_v16  ;;  %vm628_vm7 = vcmp.eq.f32.partialorder %v1487_v14, 0.0  ;;  %v493_v17 = vsub.f32 %v455_v6, %v1352_v54 }
  0xfb   : > { %v627_v15 = vsel %vm626_vm6, %v1487_v14, %v625_v12  ;;  %v314_v18 = vmul.f32 %v1373_v26, %v1373_v26  ;;  %671 = vst [vmem:[#allocation2 + $0x60] sm:$0xff] %v623_v13  ;;  %v494_v11 = vsub.f32 %v455_v6, %v1354_v55  ;;  %v421_v20 = vadd.f32 %v1419_v39, %v1375_v31 }
  0xfc   : > { %v630_v19 = vsel %vm628_vm7, %v629_v7, %v627_v15  ;;  %v511_v21 = vmul.f32 %v493_v17, %v493_v17  ;;  %vm605_vm8 = vcmp.eq.f32.partialorder %v1536_v61, inf  ;;  %vm607_vm9 = vcmp.eq.f32.partialorder %v1536_v61, 0.0 }
  0xfd   : > { %672 = vst [vmem:[#allocation2 + $0x68] sm:$0xff] %v630_v19  ;;  %v422_v22 = vadd.f32 %v1422_v42, %v314_v18  ;;  %v512_v27 = vmul.f32 %v494_v11, %v494_v11  ;;  %v608_v55 = vand.u32 2147483648, %v1536_v61  ;;  %vm612_vm10 = vcmp.eq.f32.partialorder %v1542_v0, inf }
  0xfe   : > { %v529_v51 = vadd.f32 %v511_v21, %v421_v20  ;;  %v615_v42 = vand.u32 2147483648, %v1542_v0  ;;  %vm614_vm11 = vcmp.eq.f32.partialorder %v1542_v0, 0.0  ;;  %vm647_vm12 = vcmp.eq.f32.partialorder %v1545_v47, inf }
  0xff   : > { %v1063_v25 = vpop.eup %1062  ;;  %v530_v26 = vadd.f32 %v512_v27, %v422_v22  ;;  %v650_v28 = vand.u32 2147483648, %v1545_v47  ;;  %vm649_vm13 = vcmp.eq.f32.partialorder %v1545_v47, 0.0  ;;  %vm654_vm14 = vcmp.eq.f32.partialorder %v1558_v8, inf }
 0x100   : > { %v1065_v14 = vpop.eup %1064  ;;  %v604_v54 = vmul.f32 %v1063_v25, %v1536_v61  ;;  %1070 = vrsqrt.f32 %v529_v51  ;;  %v657_v45 = vand.u32 2147483648, %v1558_v8  ;;  %vm656_vm15 = vcmp.eq.f32.partialorder %v1558_v8, 0.0 }
 0x101   : > { %v611_v29 = vmul.f32 %v1065_v14, %v1542_v0  ;;  %1072 = vrsqrt.f32 %v530_v26  ;;  %vm633_vm0 = vcmp.eq.f32.partialorder %v529_v51, inf  ;;  %v636_v58 = vand.u32 2147483648, %v529_v51 }
 0x102   : > { %v1067_v31 = vpop.eup %1066  ;;  %v606_v39 = vsel %vm605_vm8, %v1536_v61, %v604_v54  ;;  %vm635_vm1 = vcmp.eq.f32.partialorder %v529_v51, 0.0  ;;  %vm640_vm2 = vcmp.eq.f32.partialorder %v530_v26, inf  ;;  %v643_v44 = vand.u32 2147483648, %v530_v26 }
 0x103   : > { %v609_v53 = vsel %vm607_vm9, %v608_v55, %v606_v39  ;;  %v613_v30 = vsel %vm612_vm10, %v1542_v0, %v611_v29  ;;  %v646_v36 = vmul.f32 %v1067_v31, %v1545_v47  ;;  %vm642_vm3 = vcmp.eq.f32.partialorder %v530_v26, 0.0 }
 0x104   : > { %v1069_v37 = vpop.eup %1068  ;;  %v616_v32 = vsel %vm614_vm11, %v615_v42, %v613_v30  ;;  %669 = vst [vmem:[#allocation2 + $0x50] sm:$0xff] %v609_v53 }
 0x105   : > { %670 = vst [vmem:[#allocation2 + $0x58] sm:$0xff] %v616_v32  ;;  %v648_v3 = vsel %vm647_vm12, %v1545_v47, %v646_v36  ;;  %v653_v4 = vmul.f32 %v1069_v37, %v1558_v8 }
 0x106   : > { %v651_v33 = vsel %vm649_vm13, %v650_v28, %v648_v3 }
 0x107   : > { %v655_v34 = vsel %vm654_vm14, %v1558_v8, %v653_v4  ;;  %675 = vst [vmem:[#allocation2 + $0x80] sm:$0xff] %v651_v33 }
 0x108   : > { %v658_v38 = vsel %vm656_vm15, %v657_v45, %v655_v34 }
 0x109   : > { %676 = vst [vmem:[#allocation2 + $0x88] sm:$0xff] %v658_v38 }
 0x10a   : > { %v1071_v46 = vpop.eup %1070 }
 0x10b   : > { %v1073_v48 = vpop.eup %1072  ;;  %v632_v60 = vmul.f32 %v1071_v46, %v529_v51 }
 0x10c   : > { %v639_v43 = vmul.f32 %v1073_v48, %v530_v26 }
 0x10d   : > { %v634_v59 = vsel %vm633_vm0, %v529_v51, %v632_v60 }
 0x10e   : > { %v637_v40 = vsel %vm635_vm1, %v636_v58, %v634_v59  ;;  %v641_v56 = vsel %vm640_vm2, %v530_v26, %v639_v43 }
 0x10f   : > { %v644_v61 = vsel %vm642_vm3, %v643_v44, %v641_v56  ;;  %673 = vst [vmem:[#allocation2 + $0x70] sm:$0xff] %v637_v40 }
 0x110   : > { %674 = vst [vmem:[#allocation2 + $0x78] sm:$0xff] %v644_v61 }
 0x111 PF: > { %s677_s18 = sld [smem:[#allocation5 + %s1206_s26]]  ;;  %v678_v41 = vld [vmem:[#allocation2] sm:$0xff]  ;;  %v679_v57 = vld [vmem:[#allocation2 + $0x8] sm:$0xff]  ;;  %v680_v1 = vld [vmem:[#allocation2 + $0x10] sm:$0xff]  ;;  %s969_s20 = smul.u32 2304, %s1206_s26 }
 0x112   : > { %v681_v0 = vld [vmem:[#allocation2 + $0x18] sm:$0xff]  ;;  %s715_s19 = sld [smem:[#allocation4 + %s1206_s26]]  ;;  %v682_v2 = vld [vmem:[#allocation2 + $0x20] sm:$0xff]  ;;  %v683_v23 = vld [vmem:[#allocation2 + $0x28] sm:$0xff]  ;;  %s862_s21 = sshll.u32 %s1313_s13, 4  ;;  %s1666_s21 = int_to_ptr.vmem [resolvable:$true] %s862_s21 }
 0x113   : > { %v684_v62 = vld [vmem:[#allocation2 + $0x30] sm:$0xff]  ;;  %v685_v12 = vld [vmem:[#allocation2 + $0x38] sm:$0xff]  ;;  %v686_v22 = vld [vmem:[#allocation2 + $0x40] sm:$0xff]  ;;  %s1663_s0 = scalar_lea.hbm %s1720_s4, %s969_s20  ;;  %s1671_s26 = scalar_lea.sflag [#allocation7], %s186_s11 }
 0x114   : > { %v687_v14 = vld [vmem:[#allocation2 + $0x48] sm:$0xff]  ;;  %v688_v54 = vld [vmem:[#allocation2 + $0x50] sm:$0xff]  ;;  %v689_v31 = vld [vmem:[#allocation2 + $0x58] sm:$0xff]  ;;  %s1134_s29 = scalar_lea.vmem %s1666_s21, 2304  ;;  %s1221_s30 = smov [#allocation6]  }
 0x115   : > { %v690_v38 = vld [vmem:[#allocation2 + $0x60] sm:$0xff]  ;;  %v691_v58 = vld [vmem:[#allocation2 + $0x68] sm:$0xff]  ;;  %p1135_p8 = scmp.ne.s32.totalorder %s1666_s21, %s1134_s29  ;;  %s1138_s6 = sshll.u32 %s1221_s30, 4  ;;  %s1139_s6 = int_to_ptr.vmem [resolvable:$false] %s1138_s6 }
 0x116   : > { %v692_v56 = vld [vmem:[#allocation2 + $0x70] sm:$0xff]  ;;  %s1140_s8 = scalar_lea.vmem %s1139_s6, 4608  ;;  %p1141_p11 = scmp.lt.s32.totalorder %s1666_s21, %s1139_s6 }
 0x117   : > { %v1601_v47 = vstv %s677_s18  ;;  %p1136_p9 = pnand %p1135_p8, %p1295_p0  ;;  %p1142_p12 = scmp.lt.s32.totalorder %s1140_s8, %s1134_s29 }
 0x118   : > { %v697_v35 = vmul.f32 %v1601_v47, %v678_v41  ;;  %v698_v49 = vmul.f32 %v1601_v47, %v679_v57  ;;  %v699_v5 = vmul.f32 %v1601_v47, %v680_v1  ;;  %v700_v24 = vmul.f32 %v1601_v47, %v681_v0 }
 0x119   : > { %v701_v10 = vmul.f32 %v1601_v47, %v682_v2  ;;  %v702_v50 = vmul.f32 %v1601_v47, %v683_v23  ;;  %v703_v52 = vmul.f32 %v1601_v47, %v684_v62  ;;  %v704_v19 = vmul.f32 %v1601_v47, %v685_v12  ;;  %p1137_p10 = pneg %p1136_p9  ;;  %p1143_p13 = por %p1142_p12, %p1141_p11 }
 0x11a   : > { %v753_v8 = vsub.f32 0.0, %v697_v35  ;;  %v754_v9 = vsub.f32 0.0, %v698_v49  ;;  %v755_v63 = vsub.f32 0.0, %v699_v5  ;;  %v756_v6 = vsub.f32 0.0, %v700_v24 }
 0x11b   : > { %v716_v17 = vadd.f32 1.0, %v697_v35  ;;  %v757_v18 = vsub.f32 0.0, %v701_v10  ;;  %v1612_v11 = vstv %s715_s19  ;;  %v758_v20 = vsub.f32 0.0, %v702_v50  ;;  %p1144_p1 = pnand %p1143_p13, %p1137_p10 }
 0x11c   : > { %v771_v16 = vmul.f32 1.442695, %v753_v8  ;;  %v773_v7 = vmul.f32 1.442695, %v754_v9  ;;  %v775_v13 = vmul.f32 1.442695, %v755_v63  ;;  %v705_v53 = vmul.f32 %v1601_v47, %v686_v22 }
 0x11d   : > { %v777_v15 = vmul.f32 1.442695, %v756_v6  ;;  %v759_v21 = vsub.f32 0.0, %v703_v52  ;;  %v717_v27 = vadd.f32 1.0, %v698_v49  ;;  %v718_v25 = vadd.f32 1.0, %v699_v5 }
 0x11e   : > { %1074 = vpow2.f32 %v771_v16  ;;  %v779_v51 = vmul.f32 1.442695, %v757_v18  ;;  %v719_v26 = vadd.f32 1.0, %v700_v24  ;;  %v781_v55 = vmul.f32 1.442695, %v758_v20 }
 0x11f   : > { %1076 = vpow2.f32 %v773_v7  ;;  %v783_v29 = vmul.f32 1.442695, %v759_v21  ;;  %v735_v39 = vmul.f32 %v1612_v11, %v716_v17  ;;  %v760_v42 = vsub.f32 0.0, %v704_v19 }
 0x120   : > { %1078 = vpow2.f32 %v775_v13  ;;  %v720_v30 = vadd.f32 1.0, %v701_v10  ;;  %v706_v36 = vmul.f32 %v1601_v47, %v687_v14  ;;  %v707_v37 = vmul.f32 %v1601_v47, %v688_v54  ;;  %v694_v13 = vld [vmem:[#allocation2 + $0x80] sm:$0xff]  ;;  %v695_v14 = vld [vmem:[#allocation2 + $0x88] sm:$0xff] }
 0x121   : > { %1080 = vpow2.f32 %v777_v15  ;;  %v721_v32 = vadd.f32 1.0, %v702_v50  ;;  %v785_v28 = vmul.f32 1.442695, %v760_v42  ;;  %v708_v3 = vmul.f32 %v1601_v47, %v689_v31  ;;  %v693_v50 = vld [vmem:[#allocation2 + $0x78] sm:$0xff] }
 0x122   : > { %1082 = vpow2.f32 %v779_v51  ;;  %v736_v4 = vmul.f32 %v1612_v11, %v717_v27  ;;  %v722_v33 = vadd.f32 1.0, %v703_v52  ;;  %v761_v45 = vsub.f32 0.0, %v705_v53 }
 0x123   : > { %1084 = vpow2.f32 %v781_v55  ;;  %v762_v34 = vsub.f32 0.0, %v706_v36  ;;  %v737_v46 = vmul.f32 %v1612_v11, %v718_v25  ;;  %v738_v48 = vmul.f32 %v1612_v11, %v719_v26 }
 0x124   : > { %1086 = vpow2.f32 %v783_v29  ;;  %v763_v60 = vsub.f32 0.0, %v707_v37  ;;  %v739_v43 = vmul.f32 %v1612_v11, %v720_v30  ;;  %v723_v59 = vadd.f32 1.0, %v704_v19 }
 0x125   : > { %1088 = vpow2.f32 %v785_v28  ;;  %v787_v44 = vmul.f32 1.442695, %v761_v45  ;;  %v789_v40 = vmul.f32 1.442695, %v762_v34  ;;  %v740_v41 = vmul.f32 %v1612_v11, %v721_v32 }
 0x126   : > { %v791_v57 = vmul.f32 1.442695, %v763_v60  ;;  %v764_v1 = vsub.f32 0.0, %v708_v3  ;;  %v709_v0 = vmul.f32 %v1601_v47, %v690_v38  ;;  %v741_v49 = vmul.f32 %v1612_v11, %v722_v33 }
 0x127   : > { %1090 = vpow2.f32 %v787_v44  ;;  %v710_v5 = vmul.f32 %v1601_v47, %v691_v58  ;;  %v711_v8 = vmul.f32 %v1601_v47, %v692_v56  ;;  %v742_v63 = vmul.f32 %v1612_v11, %v723_v59 }
 0x128   : > { %v1075_v61 = vpop.eup %1074  ;;  %1092 = vpow2.f32 %v789_v40  ;;  %v793_v62 = vmul.f32 1.442695, %v764_v1  ;;  %v765_v6 = vsub.f32 0.0, %v709_v0  ;;  %v724_v16 = vadd.f32 1.0, %v705_v53 }
 0x129   : > { %v1077_v2 = vpop.eup %1076  ;;  %v807_v35 = vmul.f32 %v1075_v61, %v735_v39  ;;  %1094 = vpow2.f32 %v791_v57  ;;  %v766_v7 = vsub.f32 0.0, %v710_v5  ;;  %v725_v18 = vadd.f32 1.0, %v706_v36 }
 0x12a   : > { %v1079_v24 = vpop.eup %1078  ;;  %v808_v23 = vmul.f32 %v1077_v2, %v736_v4  ;;  %1096 = vpow2.f32 %v793_v62  ;;  %v726_v19 = vadd.f32 1.0, %v707_v37  ;;  %v795_v20 = vmul.f32 1.442695, %v765_v6 }
 0x12b   : > { %v1081_v9 = vpop.eup %1080  ;;  %825 = vst [vmem:[%s1313_s13] sm:$0xff] %v807_v35  ;;  %v809_v10 = vmul.f32 %v1079_v24, %v737_v46  ;;  %v797_v27 = vmul.f32 1.442695, %v766_v7  ;;  %v767_v25 = vsub.f32 0.0, %v711_v8  ;;  %v712_v51 = vmul.f32 %v1601_v47, %v693_v50 }
 0x12c   : > { %v1083_v52 = vpop.eup %1082  ;;  %826 = vst [vmem:[%s1313_s13 + $0x8] sm:$0xff] %v808_v23  ;;  %v810_v12 = vmul.f32 %v1081_v9, %v738_v48  ;;  %v727_v26 = vadd.f32 1.0, %v708_v3  ;;  %1098 = vpow2.f32 %v795_v20  ;;  %v713_v55 = vmul.f32 %v1601_v47, %v694_v13 }
 0x12d   : > { %v1085_v15 = vpop.eup %1084  ;;  %827 = vst [vmem:[%s1313_s13 + $0x10] sm:$0xff] %v809_v10  ;;  %v811_v17 = vmul.f32 %v1083_v52, %v739_v43  ;;  %v743_v31 = vmul.f32 %v1612_v11, %v724_v16  ;;  %1100 = vpow2.f32 %v797_v27  ;;  %v799_v39 = vmul.f32 1.442695, %v767_v25 }
 0x12e   : > { %v1087_v21 = vpop.eup %1086  ;;  %828 = vst [vmem:[%s1313_s13 + $0x18] sm:$0xff] %v810_v12  ;;  %v812_v22 = vmul.f32 %v1085_v15, %v740_v41  ;;  %v768_v42 = vsub.f32 0.0, %v712_v51  ;;  %v744_v30 = vmul.f32 %v1612_v11, %v725_v18  ;;  %v769_v36 = vsub.f32 0.0, %v713_v55 }
 0x12f   : > { %829 = vst [vmem:[%s1313_s13 + $0x20] sm:$0xff] %v811_v17  ;;  %v813_v54 = vmul.f32 %v1087_v21, %v741_v49  ;;  %v1089_v29 = vpop.eup %1088  ;;  %v714_v37 = vmul.f32 %v1601_v47, %v695_v14  ;;  %v745_v32 = vmul.f32 %v1612_v11, %v726_v19  ;;  %v728_v28 = vadd.f32 1.0, %v709_v0 }
 0x130   : > { %830 = vst [vmem:[%s1313_s13 + $0x28] sm:$0xff] %v812_v22  ;;  %v814_v53 = vmul.f32 %v1089_v29, %v742_v63  ;;  %1102 = vpow2.f32 %v799_v39  ;;  %v801_v3 = vmul.f32 1.442695, %v768_v42  ;;  %v746_v33 = vmul.f32 %v1612_v11, %v727_v26 }
 0x131   : > { %831 = vst [vmem:[%s1313_s13 + $0x30] sm:$0xff] %v813_v54  ;;  %v1091_v4 = vpop.eup %1090  ;;  %v729_v45 = vadd.f32 1.0, %v710_v5  ;;  %v803_v34 = vmul.f32 1.442695, %v769_v36  ;;  %v770_v38 = vsub.f32 0.0, %v714_v37  ;;  %v730_v58 = vadd.f32 1.0, %v711_v8 }
 0x132   : > { %832 = vst [vmem:[%s1313_s13 + $0x38] sm:$0xff] %v814_v53  ;;  %v1093_v46 = vpop.eup %1092  ;;  %v815_v48 = vmul.f32 %v1091_v4, %v743_v31  ;;  %1104 = vpow2.f32 %v801_v3  ;;  %v747_v40 = vmul.f32 %v1612_v11, %v728_v28  ;;  %v731_v41 = vadd.f32 1.0, %v712_v51 }
 0x133   : > { %v1095_v60 = vpop.eup %1094  ;;  %v816_v47 = vmul.f32 %v1093_v46, %v744_v30  ;;  %1106 = vpow2.f32 %v803_v34  ;;  %v805_v43 = vmul.f32 1.442695, %v770_v38  ;;  %v748_v61 = vmul.f32 %v1612_v11, %v729_v45 }
 0x134   : > { %v1097_v59 = vpop.eup %1096  ;;  %833 = vst [vmem:[%s1313_s13 + $0x40] sm:$0xff] %v815_v48  ;;  %v817_v44 = vmul.f32 %v1095_v60, %v745_v32  ;;  %v732_v57 = vadd.f32 1.0, %v713_v55  ;;  %v749_v0 = vmul.f32 %v1612_v11, %v730_v58  ;;  %v733_v49 = vadd.f32 1.0, %v714_v37 }
 0x135   : > { %834 = vst [vmem:[%s1313_s13 + $0x48] sm:$0xff] %v816_v47  ;;  %v818_v56 = vmul.f32 %v1097_v59, %v746_v33  ;;  %1108 = vpow2.f32 %v805_v43  ;;  %v750_v24 = vmul.f32 %v1612_v11, %v731_v41 }
 0x136   : > { %835 = vst [vmem:[%s1313_s13 + $0x50] sm:$0xff] %v817_v44  ;;  %v1099_v1 = vpop.eup %1098  ;;  %v751_v62 = vmul.f32 %v1612_v11, %v732_v57  ;;  %v752_v10 = vmul.f32 %v1612_v11, %v733_v49 }
 0x137   : > { %836 = vst [vmem:[%s1313_s13 + $0x58] sm:$0xff] %v818_v56  ;;  %v1101_v2 = vpop.eup %1100  ;;  %v819_v35 = vmul.f32 %v1099_v1, %v747_v40 }
 0x138   : > { %v820_v5 = vmul.f32 %v1101_v2, %v748_v61 }
 0x139   : > { %837 = vst [vmem:[%s1313_s13 + $0x60] sm:$0xff] %v819_v35 }
 0x13a   : > { %v1103_v23 = vpop.eup %1102  ;;  %838 = vst [vmem:[%s1313_s13 + $0x68] sm:$0xff] %v820_v5 }
 0x13b   : > { %v821_v8 = vmul.f32 %v1103_v23, %v749_v0 }
 0x13c   : > { %v1105_v9 = vpop.eup %1104 }
 0x13d   : > { %v1107_v63 = vpop.eup %1106  ;;  %839 = vst [vmem:[%s1313_s13 + $0x70] sm:$0xff] %v821_v8  ;;  %v822_v6 = vmul.f32 %v1105_v9, %v750_v24 }
 0x13e   : > { %v823_v50 = vmul.f32 %v1107_v63, %v751_v62 }
 0x13f   : > { %v1109_v52 = vpop.eup %1108  ;;  %840 = vst [vmem:[%s1313_s13 + $0x78] sm:$0xff] %v822_v6 }
 0x140   : > { %841 = vst [vmem:[%s1313_s13 + $0x80] sm:$0xff] %v823_v50  ;;  %v824_v12 = vmul.f32 %v1109_v52, %v752_v10 }
 0x142   : > { %842 = vst [vmem:[%s1313_s13 + $0x88] sm:$0xff] %v824_v12 }
 0x143   : > { %1147 = shalt.err (!%p1144_p1)
}
 0x144   : > { %s1148_s11 = scalar_lea.hbm %s1663_s0, 2304  ;;  %s1152_s14 = scalar_lea.hbm %s1720_s4, 9216 }
 0x145   : > { %p1149_p2 = scmp.ne.s32.totalorder %s1663_s0, %s1148_s11  ;;  %p1153_p6 = scmp.lt.u32.totalorder %s1663_s0, %s1720_s4 }
 0x146   : > { %p1154_p7 = scmp.lt.u32.totalorder %s1152_s14, %s1148_s11  ;;  %p1156_p9 = scmp.lt.u32.totalorder %s1148_s11, %s1663_s0 }
 0x147   : > { %p1150_p3 = pnand %p1149_p2, %p1295_p0 }
 0x148   : > { %p1155_p8 = por %p1154_p7, %p1153_p6 }
 0x149   : > { %p1151_p5 = pneg %p1150_p3 }
 0x14a   : > { %p1157_p10 = por %p1156_p9, %p1155_p8 }
 0x14c   : > { %p1158_p11 = pnand %p1157_p10, %p1151_p5 }
 0x14e   : > { %1161 = shalt.err (!%p1158_p11)
}
 0x14f   : > { %s1222_s17 = smov 256   ;;  %s1223_s18 = smov 16  }
 0x150   : > { %970 = dma.vmem_to_hbm [thread:$0]  (%p1295_p0), %s1666_s21, 2304, %s1663_s0, %s1671_s26, %s1222_s17, %s1222_s17, %s1223_s18  }
 0x151 PF: > { %p976_p12 = scmp.ge.s32.totalorder %s1214_s28, 2  ;;  %s877_s19 = sand.u32 1, %s1194_s1  }
 0x152   : > { %s878_s20 = scalar_lea.sflag [#allocation7], %s877_s19 }
 0x153   : > { %p973_p13 = pnand %p976_p12, %p1302_p4 }
 0x155   : > { %1189 = dma.done.wait (!%p973_p13), %s878_s20, 2304  }
 0x156   : > { %1191 = vsyncadd (!%p973_p13), %s878_s20, 4294964992  ;;  %s27_s28 = sadd.s32 1, %s1214_s28   ;;  %s1724_s1 = smov %s1198_s24 }
 0x157   : > { %p24_p1 = scmp.ge.s32.totalorder %s27_s28, 6   ;;  %s1725_s24 = smov %s1202_s25 }
 0x158   : > { %s1726_s25 = smov %s1308_s10  ;;  %s1727_s26 = smov %s1210_s27 }
 0x159   : > { %s1728_s27 = smov %s1730_s5  ;;  %26 = sbr.rel (!%p24_p1) target bundleno = 29 (0x1d), region = 70 }
 0x160   :  { %883 = vsyncpa [#allocation7], 1 }
 0x161   :  { %885 = vsyncpa [#allocation7 + $0x1], 1 }

</bundles_post_ra>
